<compile_context>
chip_gen: v7x
topology: tpu7x:2x2x1
jax: 0.10.0
libtpu: 0.0.40
codegen_flags: <defaults>
</compile_context>

<pallas_src>
import functools
import math

import jax
import jax.numpy as jnp
from jax.experimental import pallas as pl
from jax.experimental.pallas import tpu as pltpu

LOG_2PI = 1.8378770664093453  # log(2*pi)


def _round_up(x, m):
    return ((x + m - 1) // m) * m


def _cdiv(a, b):
    return (a + b - 1) // b


# --------------------------------------------------------------------------
# Kernel
# --------------------------------------------------------------------------
def _actor_kernel(expand, deterministic, A, AP, OUT_W,
                  state_ref, w1_ref, b1_ref, w2_ref, b2_ref, wh_ref, bh_ref,
                  *rest):
    if deterministic:
        (out_ref,) = rest
    else:
        eps_ref, out_ref = rest

    # MXU matmuls on bf16 operands, f32 accumulation; elementwise math in f32.
    x = state_ref[...].astype(jnp.bfloat16)
    h1 = jnp.dot(x, w1_ref[...], preferred_element_type=jnp.float32) + b1_ref[...]
    h1 = jnp.maximum(h1, 0.0).astype(jnp.bfloat16)
    h2 = jnp.dot(h1, w2_ref[...], preferred_element_type=jnp.float32) + b2_ref[...]
    h2 = jnp.maximum(h2, 0.0).astype(jnp.bfloat16)

    # Fused heads: one matmul producing [mu | log_std], each lane-aligned (AP).
    heads = jnp.dot(h2, wh_ref[...], preferred_element_type=jnp.float32) + bh_ref[...]
    mu = heads[:, :AP]
    log_std = heads[:, AP:]

    inv_std = jnp.exp(-log_std)          # EUP exp instead of a VPU divide
    if deterministic:
        u = mu
    else:
        std = jnp.exp(log_std)           # only needed on the stochastic path
        u = mu + std * eps_ref[...]
    u = jnp.clip(u, -7.5, 7.5)
    a = expand * jnp.tanh(u)

    # Normal(mu, std).log_prob(u) + tanh-squash correction (matches PyTorch
    # reference verbatim; loses precision near |u| = 7.5, same as the ref).
    z = (u - mu) * inv_std
    inv_e2 = 1.0 / (expand * expand + 1e-6)
    const = -0.5 * LOG_2PI - math.log(expand)
    logp_col = -0.5 * z * z - log_std - jnp.log(1.0 - (a * a) * inv_e2) + const

    TB = a.shape[0]
    # Mask out the zero-padded action lanes before the row-sum.
    col_a = jax.lax.broadcasted_iota(jnp.int32, (TB, AP), 1)
    logp_col = jnp.where(col_a < A, logp_col, 0.0)
    logp_sum = jnp.sum(logp_col, axis=1, keepdims=True)

    # Lane-dense fused output slab: a in lanes [0:A] (padded lanes are already
    # exactly 0), summed logp in lane A.
    a_full = a
    if OUT_W != AP:
        a_full = jnp.concatenate(
            [a_full, jnp.zeros((TB, OUT_W - AP), a_full.dtype)], axis=1)
    col_o = jax.lax.broadcasted_iota(jnp.int32, (TB, OUT_W), 1)
    out_ref[...] = jnp.where(col_o == A, logp_sum, a_full)


# --------------------------------------------------------------------------
# One-time parameter preparation (hoisted out of the per-call path)
# --------------------------------------------------------------------------
def prepare_actor_params(raw_params):
    """Pad hidden / head widths to 128, fuse the two heads, cast weights to bf16.

    raw_params = (w1, b1, w2, b2, wmu, bmu, wls, bls) with weights stored as
    (in_features, out_features) and biases as (1, out_features), all f32.
    Zero-padding is numerically exact (relu(0)=0, zero rows contribute nothing).
    """
    w1, b1, w2, b2, wmu, bmu, wls, bls = raw_params
    S, H = w1.shape
    A = wmu.shape[1]
    HP = _round_up(H, 128)
    AP = _round_up(A, 128)

    def pad2(m, rows, cols):
        return jnp.pad(m, ((0, rows - m.shape[0]), (0, cols - m.shape[1])))

    w1p = pad2(w1, S, HP).astype(jnp.bfloat16)
    b1p = pad2(b1, 1, HP)                                   # biases stay f32
    w2p = pad2(w2, HP, HP).astype(jnp.bfloat16)
    b2p = pad2(b2, 1, HP)
    wh = jnp.concatenate([pad2(wmu, HP, AP), pad2(wls, HP, AP)],
                         axis=1).astype(jnp.bfloat16)        # (HP, 2*AP)
    bh = jnp.concatenate([pad2(bmu, 1, AP), pad2(bls, 1, AP)], axis=1)

    return dict(w1=w1p, b1=b1p, w2=w2p, b2=b2p, wh=wh, bh=bh,
                S=int(S), H=int(H), HP=int(HP), A=int(A), AP=int(AP))


# --------------------------------------------------------------------------
# Tiling / VMEM budget
# --------------------------------------------------------------------------
def _select_tiling(B, S, HP, AP, OUT_W, stochastic):
    B8 = _round_up(max(int(B), 1), 8)

    # Resident weights & biases (double-buffered by the Pallas pipeline, even
    # though their block index never changes).
    weight_bytes = 2 * ((S * HP + HP * HP + HP * 2 * AP) * 2      # bf16 weights
                        + 8 * (2 * HP + 2 * AP) * 4)              # f32 biases (sublane-padded)

    def tile_bytes(tb):
        t = 2 * tb * S * 4                        # state tile, double-buffered
        if stochastic:
            t += 2 * tb * AP * 4                  # eps tile
        t += 2 * tb * OUT_W * 4                   # output tile
        t += tb * (2 * HP + 2 * AP + OUT_W) * 4   # live f32 intermediates (rough)
        t += tb * 2 * HP * 2                      # bf16 activation copies
        return t

    budget = 24 << 20                 # conservative: fits every generation
    TB = min(512, B8)
    while TB > 8 and weight_bytes + tile_bytes(TB) > budget:
        TB = max(8, _round_up(TB // 2, 8))

    # v7x megacore: prefer >= 2 grid steps when there is enough batch to share.
    if B8 >= 64:
        TB = min(TB, _round_up(_cdiv(B8, 2), 8))

    steps = _cdiv(B8, TB)
    B_pad = steps * TB
    needed = weight_bytes + tile_bytes(TB)
    vmem_limit = int(min(max(2 * needed, 16 << 20), 60 << 20))
    return TB, B_pad, steps, vmem_limit


# --------------------------------------------------------------------------
# Wrapper
# --------------------------------------------------------------------------
def actor_forward(state, prep, eps=None, *, expand, deterministic=True):
    """Actor forward.  Returns (a, log_prob) of shapes (B, A) and (B, 1)."""
    B, S_in = state.shape
    S, HP, A, AP = prep["S"], prep["HP"], prep["A"], prep["AP"]
    assert S_in == S
    OUT_W = _round_up(A + 1, 128)     # fused output slab width (a lanes + logp lane)

    stochastic = not deterministic
    TB, B_pad, steps, vmem_limit = _select_tiling(B, S, HP, AP, OUT_W, stochastic)

    # Only row-pad the state when needed (no dtype cast in the wrapper).
    state_in = state
    if B_pad != B:
        state_in = jnp.pad(state_in, ((0, B_pad - B), (0, 0)))

    if stochastic:
        if eps is None:
            raise ValueError("eps must be provided when deterministic=False")
        # eps is tiny (A columns); pad it to the lane-aligned head width so the
        # stochastic update stays pure VPU in-kernel.
        eps_in = eps.astype(jnp.float32)
        eps_in = jnp.pad(eps_in, ((0, B_pad - B), (0, AP - A)))

    batch_spec = lambda shape: pl.BlockSpec(shape, lambda i: (i, 0))
    resident_spec = lambda shape: pl.BlockSpec(shape, lambda i: (0, 0))

    in_specs = [
        batch_spec((TB, S)),            # state
        resident_spec((S, HP)),         # w1 (bf16)
        resident_spec((1, HP)),         # b1
        resident_spec((HP, HP)),        # w2 (bf16)
        resident_spec((1, HP)),         # b2
        resident_spec((HP, 2 * AP)),    # fused heads weight (bf16)
        resident_spec((1, 2 * AP)),     # fused heads bias
    ]
    args = [state_in, prep["w1"], prep["b1"], prep["w2"], prep["b2"],
            prep["wh"], prep["bh"]]
    if stochastic:
        in_specs.append(batch_spec((TB, AP)))
        args.append(eps_in)

    out_spec = batch_spec((TB, OUT_W))
    out_shape = jax.ShapeDtypeStruct((B_pad, OUT_W), jnp.float32)

    flops = 2 * B_pad * (S * HP + HP * HP + HP * 2 * AP)
    transcendentals = B_pad * AP * (4 if stochastic else 3)
    bytes_accessed = (
        B_pad * S * state.dtype.itemsize
        + (S * HP + HP * HP + HP * 2 * AP) * 2          # bf16 weights
        + (2 * HP + 2 * AP) * 4                         # biases
        + (B_pad * AP * 4 if stochastic else 0)         # eps
        + B_pad * OUT_W * 4                             # fused output
    )

    kernel = functools.partial(_actor_kernel, float(expand), bool(deterministic),
                               int(A), int(AP), int(OUT_W))

    out = pl.pallas_call(
        kernel,
        grid=(steps,),
        in_specs=in_specs,
        out_specs=out_spec,
        out_shape=out_shape,
        compiler_params=pltpu.CompilerParams(
            dimension_semantics=("parallel",),
            vmem_limit_bytes=vmem_limit),
        cost_estimate=pl.CostEstimate(
            flops=flops,
            transcendentals=transcendentals,
            bytes_accessed=bytes_accessed),
    )(*args)

    # Slice immediately (padded rows / lanes must not leak into any reduction).
    a = out[:B, :A]
    logp = out[:B, A:A + 1]
    return a, logp


# --------------------------------------------------------------------------
# Parameter init (raw, PyTorch-like layout) + pure-JAX reference
# --------------------------------------------------------------------------
def init_params(key, state_size, action_size, neu_size):
    """Deterministic synthetic parameters; weights stored as (in, out)."""
    ks = jax.random.split(key, 8)

    def lin(kw, kb, fan_in, fan_out):
        bound = 1.0 / jnp.sqrt(fan_in)
        w = jax.random.uniform(kw, (fan_in, fan_out), jnp.float32, -bound, bound)
        b = jax.random.uniform(kb, (1, fan_out), jnp.float32, -bound, bound)
        return w, b

    w1, b1 = lin(ks[0], ks[1], state_size, neu_size)
    w2, b2 = lin(ks[2], ks[3], neu_size, neu_size)
    wmu, bmu = lin(ks[4], ks[5], neu_size, action_size)
    wls, bls = lin(ks[6], ks[7], neu_size, action_size)
    return (w1, b1, w2, b2, wmu, bmu, wls, bls)


def _reference(state, raw_params, eps, expand, deterministic):
    # Mirrors the PyTorch forward (with_logprob=True), with the same bf16
    # rounding of matmul operands that the kernel applies.
    w1, b1, w2, b2, wmu, bmu, wls, bls = raw_params
    bf = lambda t: t.astype(jnp.bfloat16).astype(jnp.float32)
    h1 = jnp.maximum(bf(state) @ bf(w1) + b1, 0.0)
    h2 = jnp.maximum(bf(h1) @ bf(w2) + b2, 0.0)
    mu = bf(h2) @ bf(wmu) + bmu
    log_std = bf(h2) @ bf(wls) + bls
    std = jnp.exp(log_std)
    u = mu if deterministic else mu + std * eps
    u = jnp.clip(u, -7.5, 7.5)
    a = expand * jnp.tanh(u)
    normal_logp = -0.5 * ((u - mu) / std) ** 2 - log_std - 0.5 * LOG_2PI
    logp = normal_logp - jnp.log(1.0 - a * a / (expand * expand + 1e-6)) - jnp.log(expand)
    return a, jnp.sum(logp, axis=1, keepdims=True)


if __name__ == "__main__":
    key = jax.random.PRNGKey(0)
    k_param, k_state, k_eps = jax.random.split(key, 3)

    batch = 8
    state_size = 16
    action_size = 8
    neu_size = 32
    expand = 2.0

    raw_params = init_params(k_param, state_size, action_size, neu_size)
    prep = prepare_actor_params(raw_params)   # one-time: pad / fuse / bf16-cast
    state = jax.random.normal(k_state, (batch, state_size), jnp.float32)
    eps = jax.random.normal(k_eps, (batch, action_size), jnp.float32)

    # stochastic path (rsample/sample with caller-supplied eps ~ N(0,1))
    a, logp = actor_forward(state, prep, eps, expand=expand, deterministic=False)
    jax.block_until_ready((a, logp))
    a_ref, logp_ref = _reference(state, raw_params, eps, expand, False)
    assert jnp.allclose(a, a_ref, atol=1e-3, rtol=1e-3), "action mismatch (stochastic)"
    assert jnp.allclose(logp, logp_ref, atol=1e-3, rtol=1e-3), "logp mismatch (stochastic)"

    # deterministic path (eps neither passed nor DMA'd)
    a_d, logp_d = actor_forward(state, prep, expand=expand, deterministic=True)
    jax.block_until_ready((a_d, logp_d))
    a_dref, logp_dref = _reference(state, raw_params, eps, expand, True)
    assert jnp.allclose(a_d, a_dref, atol=1e-3, rtol=1e-3), "action mismatch (deterministic)"
    assert jnp.allclose(logp_d, logp_dref, atol=1e-3, rtol=1e-3), "logp mismatch (deterministic)"

    # TODO(synk): get_logprob (atanh inversion path) is not implemented as a kernel.
    print("KERNEL_OK")
</pallas_src>

<mosaic_0001>
module attributes {stable_mosaic.version = 11 : i64} {
  func.func @_actor_kernel(%arg0: i32, %arg1: memref<8x16xf32, #tpu.memory_space<vmem>>, %arg2: memref<16x128xbf16, #tpu.memory_space<vmem>>, %arg3: memref<1x128xf32, #tpu.memory_space<vmem>>, %arg4: memref<128x128xbf16, #tpu.memory_space<vmem>>, %arg5: memref<1x128xf32, #tpu.memory_space<vmem>>, %arg6: memref<128x256xbf16, #tpu.memory_space<vmem>>, %arg7: memref<1x256xf32, #tpu.memory_space<vmem>>, %arg8: memref<8x128xf32, #tpu.memory_space<vmem>>, %arg9: memref<8x128xf32, #tpu.memory_space<vmem>>) attributes {dimension_semantics = [#tpu.dimension_semantics<parallel>], iteration_bounds = array<i64: 1>, scalar_prefetch = 0 : i64, scratch_operands = 0 : i64, tpu.core_type = #tpu.core_type<tc>, window_params = [{transform_indices = @transform_0, window_bounds = array<i64: 8, 16>}, {pipeline_mode = #tpu.pipeline_mode<synchronous>, transform_indices = @transform_1, window_bounds = array<i64: 16, 128>}, {pipeline_mode = #tpu.pipeline_mode<synchronous>, transform_indices = @transform_2, window_bounds = array<i64: 1, 128>}, {pipeline_mode = #tpu.pipeline_mode<synchronous>, transform_indices = @transform_3, window_bounds = array<i64: 128, 128>}, {pipeline_mode = #tpu.pipeline_mode<synchronous>, transform_indices = @transform_4, window_bounds = array<i64: 1, 128>}, {pipeline_mode = #tpu.pipeline_mode<synchronous>, transform_indices = @transform_5, window_bounds = array<i64: 128, 256>}, {pipeline_mode = #tpu.pipeline_mode<synchronous>, transform_indices = @transform_6, window_bounds = array<i64: 1, 256>}, {transform_indices = @transform_7, window_bounds = array<i64: 8, 128>}, {transform_indices = @transform_8, window_bounds = array<i64: 8, 128>}]} {
    %c0 = arith.constant 0 : index
    %c0_0 = arith.constant 0 : index
    %0 = vector.load %arg1[%c0, %c0_0] : memref<8x16xf32, #tpu.memory_space<vmem>>, vector<8x16xf32>
    %1 = arith.truncf %0 : vector<8x16xf32> to vector<8x16xbf16>
    %c0_1 = arith.constant 0 : index
    %c0_2 = arith.constant 0 : index
    %2 = vector.load %arg2[%c0_1, %c0_2] : memref<16x128xbf16, #tpu.memory_space<vmem>>, vector<16x128xbf16>
    %cst = arith.constant dense<0.000000e+00> : vector<8x128xf32>
    %3 = tpu.matmul %1, %2, %cst {dimension_numbers = #tpu.dot_dimension_numbers<[1], [0], [0], [1], [0, 0, 1, 1], [], []>} : vector<8x16xbf16>, vector<16x128xbf16>, vector<8x128xf32> -> vector<8x128xf32>
    %c0_3 = arith.constant 0 : index
    %c0_4 = arith.constant 0 : index
    %4 = vector.load %arg3[%c0_3, %c0_4] : memref<1x128xf32, #tpu.memory_space<vmem>>, vector<1x128xf32>
    %5 = vector.broadcast %4 : vector<1x128xf32> to vector<8x128xf32>
    %6 = arith.addf %3, %5 : vector<8x128xf32>
    %cst_5 = arith.constant 0.000000e+00 : f32
    %7 = vector.broadcast %cst_5 : f32 to vector<8x128xf32>
    %8 = arith.maximumf %6, %7 : vector<8x128xf32>
    %9 = arith.truncf %8 : vector<8x128xf32> to vector<8x128xbf16>
    %c0_6 = arith.constant 0 : index
    %c0_7 = arith.constant 0 : index
    %10 = vector.load %arg4[%c0_6, %c0_7] : memref<128x128xbf16, #tpu.memory_space<vmem>>, vector<128x128xbf16>
    %cst_8 = arith.constant dense<0.000000e+00> : vector<8x128xf32>
    %11 = tpu.matmul %9, %10, %cst_8 {dimension_numbers = #tpu.dot_dimension_numbers<[1], [0], [0], [1], [0, 0, 1, 1], [], []>} : vector<8x128xbf16>, vector<128x128xbf16>, vector<8x128xf32> -> vector<8x128xf32>
    %c0_9 = arith.constant 0 : index
    %c0_10 = arith.constant 0 : index
    %12 = vector.load %arg5[%c0_9, %c0_10] : memref<1x128xf32, #tpu.memory_space<vmem>>, vector<1x128xf32>
    %13 = vector.broadcast %12 : vector<1x128xf32> to vector<8x128xf32>
    %14 = arith.addf %11, %13 : vector<8x128xf32>
    %cst_11 = arith.constant 0.000000e+00 : f32
    %15 = vector.broadcast %cst_11 : f32 to vector<8x128xf32>
    %16 = arith.maximumf %14, %15 : vector<8x128xf32>
    %17 = arith.truncf %16 : vector<8x128xf32> to vector<8x128xbf16>
    %c0_12 = arith.constant 0 : index
    %c0_13 = arith.constant 0 : index
    %18 = vector.load %arg6[%c0_12, %c0_13] : memref<128x256xbf16, #tpu.memory_space<vmem>>, vector<128x256xbf16>
    %cst_14 = arith.constant dense<0.000000e+00> : vector<8x256xf32>
    %19 = tpu.matmul %17, %18, %cst_14 {dimension_numbers = #tpu.dot_dimension_numbers<[1], [0], [0], [1], [0, 0, 1, 1], [], []>} : vector<8x128xbf16>, vector<128x256xbf16>, vector<8x256xf32> -> vector<8x256xf32>
    %c0_15 = arith.constant 0 : index
    %c0_16 = arith.constant 0 : index
    %20 = vector.load %arg7[%c0_15, %c0_16] : memref<1x256xf32, #tpu.memory_space<vmem>>, vector<1x256xf32>
    %21 = vector.broadcast %20 : vector<1x256xf32> to vector<8x256xf32>
    %22 = arith.addf %19, %21 : vector<8x256xf32>
    %23 = vector.extract_strided_slice %22 {offsets = [0, 0], sizes = [8, 128], strides = [1, 1]} : vector<8x256xf32> to vector<8x128xf32>
    %24 = vector.extract_strided_slice %22 {offsets = [0, 128], sizes = [8, 128], strides = [1, 1]} : vector<8x256xf32> to vector<8x128xf32>
    %cst_17 = arith.constant 0.000000e+00 : f32
    %25 = vector.broadcast %cst_17 : f32 to vector<8x128xf32>
    %26 = arith.subf %25, %24 : vector<8x128xf32>
    %27 = math.exp %26 : vector<8x128xf32>
    %28 = math.exp %24 : vector<8x128xf32>
    %c0_18 = arith.constant 0 : index
    %c0_19 = arith.constant 0 : index
    %29 = vector.load %arg8[%c0_18, %c0_19] : memref<8x128xf32, #tpu.memory_space<vmem>>, vector<8x128xf32>
    %30 = arith.mulf %28, %29 : vector<8x128xf32>
    %31 = arith.addf %23, %30 : vector<8x128xf32>
    %cst_20 = arith.constant -7.500000e+00 : f32
    %cst_21 = arith.constant 7.500000e+00 : f32
    %32 = vector.broadcast %cst_20 : f32 to vector<8x128xf32>
    %33 = arith.maximumf %32, %31 : vector<8x128xf32>
    %34 = vector.broadcast %cst_21 : f32 to vector<8x128xf32>
    %35 = arith.minimumf %34, %33 : vector<8x128xf32>
    %36 = math.tanh %35 : vector<8x128xf32>
    %cst_22 = arith.constant 2.000000e+00 : f32
    %37 = vector.broadcast %cst_22 : f32 to vector<8x128xf32>
    %38 = arith.mulf %37, %36 : vector<8x128xf32>
    %39 = arith.subf %35, %23 : vector<8x128xf32>
    %40 = arith.mulf %39, %27 : vector<8x128xf32>
    %cst_23 = arith.constant -5.000000e-01 : f32
    %41 = vector.broadcast %cst_23 : f32 to vector<8x128xf32>
    %42 = arith.mulf %41, %40 : vector<8x128xf32>
    %43 = arith.mulf %42, %40 : vector<8x128xf32>
    %44 = arith.subf %43, %24 : vector<8x128xf32>
    %45 = arith.mulf %38, %38 : vector<8x128xf32>
    %cst_24 = arith.constant 0.24999994 : f32
    %46 = vector.broadcast %cst_24 : f32 to vector<8x128xf32>
    %47 = arith.mulf %45, %46 : vector<8x128xf32>
    %cst_25 = arith.constant 1.000000e+00 : f32
    %48 = vector.broadcast %cst_25 : f32 to vector<8x128xf32>
    %49 = arith.subf %48, %47 : vector<8x128xf32>
    %50 = math.log %49 : vector<8x128xf32>
    %51 = arith.subf %44, %50 : vector<8x128xf32>
    %cst_26 = arith.constant -1.6120857 : f32
    %52 = vector.broadcast %cst_26 : f32 to vector<8x128xf32>
    %53 = arith.addf %51, %52 : vector<8x128xf32>
    %54 = tpu.iota {dimensions = array<i32: 1>} : vector<8x128xi32>
    %c8_i32 = arith.constant 8 : i32
    %55 = vector.broadcast %c8_i32 : i32 to vector<8x128xi32>
    %56 = arith.cmpi slt, %54, %55 : vector<8x128xi32>
    %cst_27 = arith.constant 0.000000e+00 : f32
    %57 = vector.broadcast %cst_27 : f32 to vector<8x128xf32>
    %58 = arith.select %56, %53, %57 : vector<8x128xi1>, vector<8x128xf32>
    %cst_28 = arith.constant dense<0.000000e+00> : vector<8xf32>
    %59 = vector.multi_reduction <add>, %58, %cst_28 [1] : vector<8x128xf32> to vector<8xf32>
    %60 = vector.shape_cast %59 : vector<8xf32> to vector<8x1xf32>
    %61 = tpu.iota {dimensions = array<i32: 1>} : vector<8x128xi32>
    %c8_i32_29 = arith.constant 8 : i32
    %62 = vector.broadcast %c8_i32_29 : i32 to vector<8x128xi32>
    %63 = arith.cmpi eq, %61, %62 : vector<8x128xi32>
    %64 = vector.shape_cast %60 : vector<8x1xf32> to vector<8x1xf32>
    %65 = vector.broadcast %64 : vector<8x1xf32> to vector<8x128xf32>
    %66 = arith.select %63, %65, %38 : vector<8x128xi1>, vector<8x128xf32>
    %c0_30 = arith.constant 0 : index
    %c0_31 = arith.constant 0 : index
    %67 = vector.load %arg9[%c0_30, %c0_31] : memref<8x128xf32, #tpu.memory_space<vmem>>, vector<8x128xf32>
    tpu.vector_store %arg9[%c0_30, %c0_31], %66 {strides = array<i32>} : memref<8x128xf32, #tpu.memory_space<vmem>>, vector<8x128xf32>,
    return
  }
  func.func @transform_0(%arg0: i32) -> (i32, i32) {
    %c0_i32 = arith.constant 0 : i32
    %c0_i32_0 = arith.constant 0 : i32
    return %arg0, %c0_i32 : i32, i32
  }
  func.func @transform_1(%arg0: i32) -> (i32, i32) {
    %c0_i32 = arith.constant 0 : i32
    %c0_i32_0 = arith.constant 0 : i32
    %c0_i32_1 = arith.constant 0 : i32
    return %c0_i32, %c0_i32_0 : i32, i32
  }
  func.func @transform_2(%arg0: i32) -> (i32, i32) {
    %c0_i32 = arith.constant 0 : i32
    %c0_i32_0 = arith.constant 0 : i32
    %c0_i32_1 = arith.constant 0 : i32
    return %c0_i32, %c0_i32_0 : i32, i32
  }
  func.func @transform_3(%arg0: i32) -> (i32, i32) {
    %c0_i32 = arith.constant 0 : i32
    %c0_i32_0 = arith.constant 0 : i32
    %c0_i32_1 = arith.constant 0 : i32
    return %c0_i32, %c0_i32_0 : i32, i32
  }
  func.func @transform_4(%arg0: i32) -> (i32, i32) {
    %c0_i32 = arith.constant 0 : i32
    %c0_i32_0 = arith.constant 0 : i32
    %c0_i32_1 = arith.constant 0 : i32
    return %c0_i32, %c0_i32_0 : i32, i32
  }
  func.func @transform_5(%arg0: i32) -> (i32, i32) {
    %c0_i32 = arith.constant 0 : i32
    %c0_i32_0 = arith.constant 0 : i32
    %c0_i32_1 = arith.constant 0 : i32
    return %c0_i32, %c0_i32_0 : i32, i32
  }
  func.func @transform_6(%arg0: i32) -> (i32, i32) {
    %c0_i32 = arith.constant 0 : i32
    %c0_i32_0 = arith.constant 0 : i32
    %c0_i32_1 = arith.constant 0 : i32
    return %c0_i32, %c0_i32_0 : i32, i32
  }
  func.func @transform_7(%arg0: i32) -> (i32, i32) {
    %c0_i32 = arith.constant 0 : i32
    %c0_i32_0 = arith.constant 0 : i32
    return %arg0, %c0_i32 : i32, i32
  }
  func.func @transform_8(%arg0: i32) -> (i32, i32) {
    %c0_i32 = arith.constant 0 : i32
    %c0_i32_0 = arith.constant 0 : i32
    return %arg0, %c0_i32 : i32, i32
  }
}

</mosaic_0001>

<bundles_post_ra>
// kernel: tpu_custom_call.1
= control target key start
LH: loop header
LB: loop body
LE: loop exit
PB: predicated region body
PF: predicated region fallthrough
CT: control target
= control target key end

     0   :  { %13 = vsyncpa [#allocation3], 0  ;;  %s831_s0 = inlined_call_operand.hbm [shape: f32[8,16], index: 0, kind: input, shape index: {}]   ;;  %s832_s1 = inlined_call_operand.hbm [shape: bf16[16,128], index: 1, kind: input, shape index: {}]   ;;  %s833_s2 = inlined_call_operand.vmem [shape: f32[1,128], index: 2, kind: input, shape index: {}]   ;;  %s834_s3 = inlined_call_operand.hbm [shape: bf16[128,128], index: 3, kind: input, shape index: {}]   ;;  %s835_s4 = inlined_call_operand.vmem [shape: f32[1,128], index: 4, kind: input, shape index: {}]   ;;  %s836_s5 = inlined_call_operand.hbm [shape: bf16[128,256], index: 5, kind: input, shape index: {}]   ;;  %s837_s6 = inlined_call_operand.vmem [shape: f32[1,256], index: 6, kind: input, shape index: {}]   ;;  %s838_s7 = inlined_call_operand.vmem [shape: f32[8,128], index: 7, kind: input, shape index: {}]   ;;  %s839_s8 = inlined_call_operand.hbm [shape: f32[8,128], index: 8, kind: output, shape index: {}]  }
   0x1   :  { %14 = vsyncpa [#allocation6], 0 }
   0x2   :  { %15 = vsyncpa [#allocation9], 0 }
   0x3   :  { %16 = vsyncpa [#allocation4], 0  ;;  %s696_s27 = smov [#allocation5]   ;;  %s578_s9 = scalar_lea.hbm %s832_s1, 128 }
   0x4   :  { %s32_s28 = sshll.u32 %s696_s27, 4  ;;  %p579_p0 = scmp.ne.s32.totalorder %s832_s1, %s578_s9  ;;  %s33_s28 = int_to_ptr.vmem [resolvable:$true] %s32_s28 }
   0x5   :  { %p582_p1 = scmp.lt.u32.totalorder %s578_s9, %s832_s1 }
   0x7   :  { %p584_p2 = pnand %p582_p1, %p579_p0 }
   0x9   :  { %587 = shalt.err (!%p584_p2)
}
   0xa   :  { %s588_s14 = scalar_lea.vmem %s33_s28, 128  ;;  %p593_p4 = scmp.lt.s32.totalorder %s33_s28, %s33_s28 }
   0xb   :  { %p589_p3 = scmp.ne.s32.totalorder %s33_s28, %s588_s14  ;;  %p594_p5 = scmp.lt.s32.totalorder %s588_s14, %s588_s14 }
   0xd   :  { %p595_p6 = por %p594_p5, %p593_p4 }
   0xf   :  { %p596_p7 = pnand %p595_p6, %p589_p3 }
  0x11   :  { %599 = shalt.err (!%p596_p7)
}
  0x12   :  { %s697_s15 = smov 64   ;;  %s698_s16 = smov 4  }
  0x13   :  { %38 = dma.hbm_to_vmem [thread:$0]  %s832_s1, 128, %s33_s28, [#allocation6], %s697_s15, %s697_s15, %s698_s16  }
  0x14   :  { %s699_s19 = smov [#allocation2]   ;;  %s700_s21 = smov [#allocation7]  }
  0x15   :  { %s23_s20 = sshll.u32 %s699_s19, 4  ;;  %s46_s22 = sshll.u32 %s700_s21, 4  ;;  %s24_s20 = int_to_ptr.vmem [resolvable:$true] %s23_s20  ;;  %s47_s22 = int_to_ptr.vmem [resolvable:$true] %s46_s22 }
  0x16   :  { %s600_s25 = scalar_lea.hbm %s831_s0, 128 }
  0x17   :  { %p601_p8 = scmp.ne.s32.totalorder %s831_s0, %s600_s25  ;;  %p604_p9 = scmp.lt.u32.totalorder %s600_s25, %s831_s0 }
  0x19   :  { %p606_p10 = pnand %p604_p9, %p601_p8 }
  0x1b   :  { %609 = shalt.err (!%p606_p10)
}
  0x1c   :  { %s610_s1 = scalar_lea.vmem %s24_s20, 128  ;;  %p615_p12 = scmp.lt.s32.totalorder %s24_s20, %s24_s20 }
  0x1d   :  { %p611_p11 = scmp.ne.s32.totalorder %s24_s20, %s610_s1  ;;  %p616_p13 = scmp.lt.s32.totalorder %s610_s1, %s610_s1 }
  0x1f   :  { %p617_p0 = por %p616_p13, %p615_p12 }
  0x21   :  { %p618_p1 = pnand %p617_p0, %p611_p11 }
  0x23   :  { %621 = shalt.err (!%p618_p1)
}
  0x24   :  { %26 = dma.hbm_to_vmem [thread:$0]  %s831_s0, 128, %s24_s20, [#allocation3]  }
  0x25   :  { %s622_s12 = scalar_lea.hbm %s834_s3, 1024 }
  0x26   :  { %p623_p2 = scmp.ne.s32.totalorder %s834_s3, %s622_s12  ;;  %p626_p3 = scmp.lt.u32.totalorder %s622_s12, %s834_s3 }
  0x28   :  { %p628_p4 = pnand %p626_p3, %p623_p2 }
  0x2a   :  { %631 = shalt.err (!%p628_p4)
}
  0x2b   :  { %s632_s19 = scalar_lea.vmem %s47_s22, 1024  ;;  %p637_p6 = scmp.lt.s32.totalorder %s47_s22, %s47_s22 }
  0x2c   :  { %p633_p5 = scmp.ne.s32.totalorder %s47_s22, %s632_s19  ;;  %p638_p7 = scmp.lt.s32.totalorder %s632_s19, %s632_s19 }
  0x2e   :  { %p639_p8 = por %p638_p7, %p637_p6 }
  0x30   :  { %p640_p9 = pnand %p639_p8, %p633_p5 }
  0x32   :  { %643 = shalt.err (!%p640_p9)
}
  0x33   :  { %52 = dma.hbm_to_vmem [thread:$0]  %s834_s3, 1024, %s47_s22, [#allocation6], %s697_s15, %s697_s15, %s698_s16  }
  0x34   :  { %s701_s21 = smov [#allocation8]   ;;  %s644_s26 = scalar_lea.hbm %s836_s5, 2048 }
  0x35   :  { %s60_s23 = sshll.u32 %s701_s21, 4  ;;  %p645_p10 = scmp.ne.s32.totalorder %s836_s5, %s644_s26  ;;  %s61_s23 = int_to_ptr.vmem [resolvable:$true] %s60_s23 }
  0x36   :  { %p648_p11 = scmp.lt.u32.totalorder %s644_s26, %s836_s5 }
  0x38   :  { %p650_p12 = pnand %p648_p11, %p645_p10 }
  0x3a   :  { %653 = shalt.err (!%p650_p12)
}
  0x3b   :  { %s654_s28 = scalar_lea.vmem %s61_s23, 2048  ;;  %p659_p0 = scmp.lt.s32.totalorder %s61_s23, %s61_s23 }
  0x3c   :  { %p655_p13 = scmp.ne.s32.totalorder %s61_s23, %s654_s28  ;;  %p660_p1 = scmp.lt.s32.totalorder %s654_s28, %s654_s28 }
  0x3e   :  { %p661_p2 = por %p660_p1, %p659_p0 }
  0x40   :  { %p662_p3 = pnand %p661_p2, %p655_p13 }
  0x42   :  { %665 = shalt.err (!%p662_p3)
}
  0x43   :  { %s702_s3 = smov 128   ;;  %s703_s15 = smov 8  }
  0x44   :  { %66 = dma.hbm_to_vmem [thread:$0]  %s836_s5, 2048, %s61_s23, [#allocation9], %s702_s3, %s702_s3, %s703_s15  }
  0x45   :  { %688 = dma.done.wait [#allocation3], 128  }
  0x46   :  { %689 = vsyncadd [#allocation3], 4294967168 }
  0x47   :  { %690 = dma.done.wait [#allocation6], 1152  }
  0x48   :  { %691 = vsyncadd [#allocation6], 4294966144 }
  0x49   :  { %692 = dma.done.wait [#allocation9], 2048  }
  0x4a   :  { %693 = vsyncadd [#allocation9], 4294965248  ;;  %v704_v0 = vmov 0.0   ;;  %vm705_vm0 = vmmov 0   ;;  %v537_v1 = vld [vmem:[#allocation5] sm:$0xff]   ;;  %v84_v2 = vld [vmem:[#allocation2] sm:$0xff]  ;;  %v278_v45 = vlaneseq }
  0x4b   :  { %499 = vmatprep.subr.bf16.mxu0 %v704_v0  ;;  %501 = vmatprep.mubr.msk.bf16.mxu0 %vm705_vm0, %v704_v0  ;;  %v85_v3 = vpack.c.bf16 %v84_v2, %v84_v2  ;;  %vm101_vm1 = vcmask 130048   ;;  %v538_v4 = vld [vmem:[#allocation7] sm:$0xff]   ;;  %v539_v5 = vld [vmem:[#allocation7 + $0x8] sm:$0xff]   ;;  %v540_v6 = vld [vmem:[#allocation7 + $0x10] sm:$0xff]   ;;  %v706_v36 = vmov 0  }
  0x4c   :  { %505 = vmatprep.subr.bf16.mxu1 %v704_v0  ;;  %521 = vmatprep.mubr.msk.bf16.mxu1 %vm705_vm0, %v704_v0  ;;  %v541_v7 = vld [vmem:[#allocation7 + $0x18] sm:$0xff]   ;;  %v542_v8 = vld [vmem:[#allocation7 + $0x20] sm:$0xff]   ;;  %v543_v9 = vld [vmem:[#allocation7 + $0x28] sm:$0xff]   ;;  %v279_v46 = vshrl.u32 %v278_v45, 7 }
  0x4d   :  { %500 = vmatpush3.bf16.msra.mxu0 %v537_v1  ;;  %506 = vmatpush3.bf16.msra.mxu1 %v538_v4  ;;  %v544_v10 = vld [vmem:[#allocation7 + $0x30] sm:$0xff]   ;;  %v545_v11 = vld [vmem:[#allocation7 + $0x38] sm:$0xff]   ;;  %v546_v12 = vld [vmem:[#allocation8] ss:$8 sps:$4 sm:$0xff]  }
  0x4e   :  { %507 = vmatprep.subr.bf16.mxu1 %v704_v0  ;;  %v548_v13 = vld [vmem:[#allocation8 + $0x4] ss:$8 sps:$4 sm:$0xff]   ;;  %v551_v14 = vld [vmem:[#allocation8 + $0x14] ss:$8 sps:$4 sm:$0xff]   ;;  %v549_v15 = vld [vmem:[#allocation8 + $0x10] ss:$8 sps:$4 sm:$0xff]  }
  0x4f   :  { %368 = vmatprep.subr.bf16.mxu0 %v548_v13  ;;  %v554_v16 = vld [vmem:[#allocation8 + $0x24] ss:$8 sps:$4 sm:$0xff]   ;;  %v552_v17 = vld [vmem:[#allocation8 + $0x20] ss:$8 sps:$4 sm:$0xff]   ;;  %v557_v18 = vld [vmem:[#allocation8 + $0x34] ss:$8 sps:$4 sm:$0xff]  }
  0x50   :  { %502 = vmatmul.mubr.msk.bf16.vlgmr.msra.gmra.mrb[0].mxu0 %vm101_vm1, %v85_v3  ;;  %v555_v19 = vld [vmem:[#allocation8 + $0x30] ss:$8 sps:$4 sm:$0xff]   ;;  %v560_v20 = vld [vmem:[#allocation8 + $0x44] ss:$8 sps:$4 sm:$0xff]   ;;  %v558_v21 = vld [vmem:[#allocation8 + $0x40] ss:$8 sps:$4 sm:$0xff]  }
  0x51   :  { %508 = vmatpush3.bf16.msra.mxu1 %v539_v5  ;;  %369 = vmatpush1.bf16.msra.mxu0 %v546_v12  ;;  %v563_v22 = vld [vmem:[#allocation8 + $0x54] ss:$8 sps:$4 sm:$0xff]   ;;  %v561_v23 = vld [vmem:[#allocation8 + $0x50] ss:$8 sps:$4 sm:$0xff]   ;;  %v566_v24 = vld [vmem:[#allocation8 + $0x64] ss:$8 sps:$4 sm:$0xff]  }
  0x52   :  { %509 = vmatprep.subr.bf16.mxu1 %v704_v0  ;;  %370 = vmatprep.subr.bf16.mxu0 %v551_v14  ;;  %v564_v25 = vld [vmem:[#allocation8 + $0x60] ss:$8 sps:$4 sm:$0xff]   ;;  %v459_v26 = vld [vmem:[%s833_s2] ss:$0 sm:$0xff]  ;;  %v569_v34 = vld [vmem:[#allocation8 + $0x74] ss:$8 sps:$4 sm:$0xff]  }
  0x53   :  { %v567_v35 = vld [vmem:[#allocation8 + $0x70] ss:$8 sps:$4 sm:$0xff]   ;;  %400 = vmatprep.mubr.bf16.mxu0 %v706_v36  ;;  %v284_v47 = vsub.s32 1, %v279_v46  ;;  %v280_v57 = vsub.s32 0, %v279_v46  ;;  %v434_v14 = vand.u32 127, %v278_v45 }
  0x54   :  { %v462_v37 = vld [vmem:[%s835_s4] ss:$0 sm:$0xff] }
  0x55   :  { %510 = vmatpush3.bf16.msra.mxu1 %v540_v6  ;;  %371 = vmatpush1.bf16.msra.mxu0 %v549_v15  ;;  %v276_v48 = vld [vmem:[%s837_s6] sm:$0x3]  ;;  %vm435_vm2 = vcmp.lt.s32.totalorder %v434_v14, 8  ;;  %s707_s6 = smov [#allocation10]   ;;  %vm439_vm3 = vcmp.eq.s32.totalorder %v434_v14, 8 }
  0x56   :  { %511 = vmatprep.subr.bf16.mxu1 %v704_v0  ;;  %372 = vmatprep.subr.bf16.mxu0 %v554_v16  ;;  %v285_v49 = vrot.slane %v276_v48, %v284_v47  ;;  %v281_v59 = vrot.slane %v276_v48, %v280_v57  ;;  %v414_v60 = vld [vmem:[%s838_s7] sm:$0xff]  ;;  %s448_s7 = sshll.u32 %s707_s6, 4  ;;  %s449_s7 = int_to_ptr.vmem [resolvable:$true] %s448_s7 }
  0x57   :  { %s666_s14 = scalar_lea.vmem %s449_s7, 128  ;;  %p671_p5 = scmp.lt.s32.totalorder %s449_s7, %s449_s7 }
  0x58   :  { %p667_p4 = scmp.ne.s32.totalorder %s449_s7, %s666_s14  ;;  %p672_p6 = scmp.lt.s32.totalorder %s666_s14, %s666_s14 }
  0x59   :  { %512 = vmatpush3.bf16.msra.mxu1 %v541_v7  ;;  %373 = vmatpush1.bf16.msra.mxu0 %v552_v17 }
  0x5a   :  { %513 = vmatprep.subr.bf16.mxu1 %v704_v0  ;;  %374 = vmatprep.subr.bf16.mxu0 %v557_v18  ;;  %p673_p7 = por %p672_p6, %p671_p5 }
  0x5c   :  { %p674_p8 = pnand %p673_p7, %p667_p4 }
  0x5d   :  { %514 = vmatpush3.bf16.msra.mxu1 %v542_v8  ;;  %375 = vmatpush1.bf16.msra.mxu0 %v555_v19 }
  0x5e   :  { %515 = vmatprep.subr.bf16.mxu1 %v704_v0  ;;  %376 = vmatprep.subr.bf16.mxu0 %v560_v20 }
  0x61   :  { %516 = vmatpush3.bf16.msra.mxu1 %v543_v9  ;;  %377 = vmatpush1.bf16.msra.mxu0 %v558_v21 }
  0x62   :  { %517 = vmatprep.subr.bf16.mxu1 %v704_v0  ;;  %378 = vmatprep.subr.bf16.mxu0 %v563_v22 }
  0x65   :  { %518 = vmatpush3.bf16.msra.mxu1 %v544_v10  ;;  %379 = vmatpush1.bf16.msra.mxu0 %v561_v23 }
  0x66   :  { %519 = vmatprep.subr.bf16.mxu1 %v704_v0  ;;  %380 = vmatprep.subr.bf16.mxu0 %v566_v24 }
  0x69   :  { %520 = vmatpush3.bf16.msra.mxu1 %v545_v11  ;;  %381 = vmatpush1.bf16.msra.mxu0 %v564_v25 }
  0x6a   :  { %382 = vmatprep.subr.bf16.mxu0 %v569_v34 }
  0x6d   :  { %383 = vmatpush1.bf16.msra.mxu0 %v567_v35 }
 0x123   :  { %v139_v27 = vpop.f32.mrb[0].mxu0 }
 0x124   :  { %v140_v28 = vadd.f32 %v459_v26, %v139_v27  ;;  %v503_v29 = vpop.f32.mrb[1].mxu0 }
 0x125   :  { %v142_v30 = vpop.f32.mrb[2].mxu0 }
 0x126   :  { %v145_v31 = vmax.f32 %v140_v28, 0.0  ;;  %v504_v32 = vpop.f32.mrb[3].mxu0 }
 0x128   :  { %v146_v33 = vpack.c.bf16 %v145_v31, %v145_v31 }
 0x12a   :  { %522 = vmatmul.mubr.bf16.vlgmr.msra.gmra.mrb[0].mxu1 %v146_v33 }
 0x1fd   :  { %v252_v38 = vpop.f32.mrb[0].mxu1 }
 0x1fe   :  { %v253_v39 = vadd.f32 %v462_v37, %v252_v38  ;;  %v523_v40 = vpop.f32.mrb[1].mxu1 }
 0x1ff   :  { %v255_v41 = vpop.f32.mrb[2].mxu1 }
 0x200   :  { %v258_v42 = vmax.f32 %v253_v39, 0.0  ;;  %v524_v43 = vpop.f32.mrb[3].mxu1 }
 0x202   :  { %v259_v44 = vpack.c.bf16 %v258_v42, %v258_v42 }
 0x204   :  { %401 = vmatmul.mubr.bf16.vlgmr.msra.gmra.mrb[4].mxu0 %v259_v44 }
 0x2d7   :  { %v402_v50 = vpop.f32.mrb[4].mxu0 }
 0x2d8   :  { %v404_v51 = vpop.f32.mrb[5].mxu0  ;;  %v403_v62 = vadd.f32 %v402_v50, %v281_v59 }
 0x2d9   :  { %v405_v52 = vadd.f32 %v404_v51, %v285_v49  ;;  %v406_v53 = vpop.f32.mrb[6].mxu0 }
 0x2da   :  { %v407_v54 = vpop.f32.mrb[7].mxu0 }
 0x2db   :  { %v412_v55 = vmul.f32 1.442695, %v405_v52  ;;  %v409_v56 = vsub.f32 0.0, %v405_v52 }
 0x2dd   :  { %570 = vpow2.f32 %v412_v55  ;;  %v410_v58 = vmul.f32 1.442695, %v409_v56 }
 0x2df   :  { %572 = vpow2.f32 %v410_v58 }
 0x2e7   :  { %v571_v61 = vpop.eup %570 }
 0x2e8   :  { %v415_v63 = vmul.f32 %v571_v61, %v414_v60 }
 0x2e9   :  { %v573_v3 = vpop.eup %572 }
 0x2ea   :  { %v416_v0 = vadd.f32 %v415_v63, %v403_v62 }
 0x2ec   :  { %v487_v1 = vclamps-f32 %v416_v0, 7.5 }
 0x2ee   :  { %574 = vtanh.f32 %v487_v1  ;;  %v421_v2 = vsub.f32 %v487_v1, %v403_v62 }
 0x2f0   :  { %v422_v4 = vmul.f32 %v573_v3, %v421_v2 }
 0x2f2   :  { %v423_v5 = vmul.f32 -0.5, %v422_v4 }
 0x2f4   :  { %v424_v6 = vmul.f32 %v423_v5, %v422_v4 }
 0x2f6   :  { %v425_v7 = vsub.f32 %v424_v6, %v405_v52 }
 0x2f8   :  { %v575_v8 = vpop.eup %574 }
 0x2f9   :  { %v420_v9 = vmul.f32 2.0, %v575_v8 }
 0x2fb   :  { %v426_v10 = vmul.f32 %v420_v9, %v420_v9 }
 0x2fd   :  { %v427_v11 = vmul.f32 0.24999994, %v426_v10 }
 0x2ff   :  { %v428_v12 = vsub.f32 1.0, %v427_v11 }
 0x301   :  { %576 = vlog2.f32 %v428_v12 }
 0x30b   :  { %v577_v13 = vpop.eup %576 }
 0x30c   :  { %v430_v15 = vmul.f32 0.6931472, %v577_v13 }
 0x30e   :  { %v431_v16 = vsub.f32 %v425_v7, %v430_v15 }
 0x310   :  { %v432_v17 = vadd.f32 -1.6120857, %v431_v16 }
 0x312   :  { %v436_v18 = vsel %vm435_vm2, %v432_v17, 0.0 }
 0x313   :  { %437 = vadd.xlane.f32.xlu0 %v436_v18 }
 0x3a0   :  { %v438_v19 = vpop.xlane.xlu0 %437 }
 0x3a1   :  { %v440_v20 = vsel %vm439_vm3, %v438_v19, %v420_v9 }
 0x3a2   :  { %441 = vst [vmem:[#allocation10] sm:$0xff] %v440_v20 }
 0x3a3   :  { %677 = shalt.err (!%p674_p8)
}
 0x3a4   :  { %s678_s19 = scalar_lea.hbm %s839_s8, 128 }
 0x3a5   :  { %p679_p9 = scmp.ne.s32.totalorder %s839_s8, %s678_s19  ;;  %p682_p10 = scmp.lt.u32.totalorder %s678_s19, %s839_s8 }
 0x3a7   :  { %p684_p11 = pnand %p682_p10, %p679_p9 }
 0x3a9   :  { %687 = shalt.err (!%p684_p11)
}
 0x3aa   :  { %451 = dma.vmem_to_hbm [thread:$0]  %s449_s7, 128, %s839_s8, [#allocation4]  }
 0x3ab   :  { %694 = dma.done.wait [#allocation4], 128  }
 0x3ac   :  { %695 = vsyncadd [#allocation4], 4294967168 }
 0x3ad   :  { %455 = vsyncpa [#allocation3], 1 }
 0x3ae   :  { %456 = vsyncpa [#allocation6], 1 }
 0x3af   :  { %457 = vsyncpa [#allocation9], 1 }
 0x3b0   :  { %458 = vsyncpa [#allocation4], 1 }

</bundles_post_ra>
